<compile_context>
chip_gen: v6e
topology: v6e:2x2x1
jax: 0.10.0
libtpu: 0.0.40
codegen_flags: <defaults>
</compile_context>

<pallas_src>
import functools
import math

import jax
import jax.numpy as jnp
from jax.experimental import pallas as pl
from jax.experimental.pallas import tpu as pltpu


def mha_kernel(q_ref, k_ref, v_ref,
               wq_ref, bq_ref, wk_ref, bk_ref,
               wv_ref, bv_ref, wc_ref, bc_ref,
               o_ref, *, n_head, seq_len):
    """One grid step processes `block_b` batch elements.

    Ref shapes:
      q/k/v/o : (block_b * seq_len, d_model)   activations, lane dim = d_model
      w_*     : (d_model, d_model)             lane-dense, grid-constant
      b_*     : (1, d_model)
    """
    rows, d_model = q_ref.shape
    block_b = rows // seq_len
    d_tensor = d_model // n_head
    n_group = block_b * n_head          # fused (batch, head) axis for attention

    def project_split(x_ref, w_ref, b_ref):
        # One full-width (rows, D) @ (D, D) MXU matmul (N = d_model), no
        # per-head activation broadcast and no dt-minor weight tiles.
        y = jnp.dot(x_ref[...], w_ref[...],
                    preferred_element_type=jnp.float32) + b_ref[...]
        # Lane-aligned head split == the module's split():
        # (B*L, H*dt) -> (B, L, H, dt) -> (B, H, L, dt) -> (B*H, L, dt)
        y = y.reshape(block_b, seq_len, n_head, d_tensor)
        return jnp.swapaxes(y, 1, 2).reshape(n_group, seq_len, d_tensor)

    # 1/sqrt(d_tensor) is folded into wq/bq on the host -> no in-kernel scale.
    qh = project_split(q_ref, wq_ref, bq_ref)
    kh = project_split(k_ref, wk_ref, bk_ref)
    vh = project_split(v_ref, wv_ref, bv_ref)

    # Scaled dot-product attention, batched over (batch*head); the 'gkt'
    # contraction feeds K to the MXU transposed directly (no kh.T copy).
    s = jnp.einsum("gqt,gkt->gqk", qh, kh,
                   preferred_element_type=jnp.float32)          # (G, L, L)
    s = s - jnp.max(s, axis=-1, keepdims=True)
    p = jnp.exp(s)
    # Exact divide: kernel is not EUP-bound, and exact softmax keeps PyTorch
    # parity to f32 precision (review correctness item).
    p = p / jnp.sum(p, axis=-1, keepdims=True)

    ctx = jnp.einsum("gqk,gkt->gqt", p, vh,
                     preferred_element_type=jnp.float32)        # (G, L, dt)

    # Head merge (the module's concat()) then ONE (rows, D) @ (D, D) output
    # projection instead of H batched (L,dt)@(dt,D) matmuls + a head-sum.
    ctx = jnp.swapaxes(ctx.reshape(block_b, n_head, seq_len, d_tensor), 1, 2)
    ctx = ctx.reshape(rows, d_model)
    out = jnp.dot(ctx, wc_ref[...],
                  preferred_element_type=jnp.float32) + bc_ref[...]
    o_ref[...] = out.astype(o_ref.dtype)
    # TODO(synk): mask / dropout branches of Attention.forward are unused in the
    # module's default forward path and are not implemented.


def multi_head_attention(q, k, v, params, n_head, *, block_b=None):
    B, L, D = q.shape
    dt = D // n_head
    assert n_head * dt == D

    # Batch elements per grid step: amortizes per-step pipeline overhead.
    # (On v7x with very small B one may prefer block_b = cdiv(B, 2) so both
    #  TensorCores get a "parallel" step.)
    if block_b is None:
        block_b = min(B, 8)
    while B % block_b:
        block_b -= 1
    grid_b = B // block_b
    rows = block_b * L

    # Host-side (plain XLA) parameter prep: fold the softmax scale into the
    # Q projection; keep all weights lane-dense (D last), biases as (1, D).
    scale = 1.0 / math.sqrt(dt)
    wq = params["wq"] * scale
    bq = (params["bq"] * scale).reshape(1, D)
    wk = params["wk"]
    bk = params["bk"].reshape(1, D)
    wv = params["wv"]
    bv = params["bv"].reshape(1, D)
    wc = params["wc"]
    bc = params["bc"].reshape(1, D)

    # Free row-major reshape: kernel sees a flat (rows, D) activation slab.
    q2 = q.reshape(B * L, D)
    k2 = k.reshape(B * L, D)
    v2 = v.reshape(B * L, D)

    seq_spec = pl.BlockSpec((rows, D), lambda i: (i, 0))
    w_spec = pl.BlockSpec((D, D), lambda i: (0, 0))      # grid-constant
    b_spec = pl.BlockSpec((1, D), lambda i: (0, 0))      # grid-constant

    kernel = functools.partial(mha_kernel, n_head=n_head, seq_len=L)

    out2 = pl.pallas_call(
        kernel,
        out_shape=jax.ShapeDtypeStruct((B * L, D), q.dtype),
        grid_spec=pltpu.PrefetchScalarGridSpec(
            num_scalar_prefetch=0,
            grid=(grid_b,),
            in_specs=[seq_spec, seq_spec, seq_spec,
                      w_spec, b_spec,      # w_q, b_q (scale folded in)
                      w_spec, b_spec,      # w_k, b_k
                      w_spec, b_spec,      # w_v, b_v
                      w_spec, b_spec],     # w_concat, b_concat
            out_specs=seq_spec,
        ),
        compiler_params=pltpu.CompilerParams(
            dimension_semantics=("parallel",)),
    )(q2, k2, v2, wq, bq, wk, bk, wv, bv, wc, bc)

    return out2.reshape(B, L, D)


def reference_mha(q, k, v, params, n_head):
    """Pure-JAX reference mirroring the PyTorch module."""
    B, L, D = q.shape
    dt = D // n_head

    def linear(x, w, b):
        return x @ w + b

    qp = linear(q, params["wq"], params["bq"])
    kp = linear(k, params["wk"], params["bk"])
    vp = linear(v, params["wv"], params["bv"])

    def split(t):
        return t.reshape(B, L, n_head, dt).transpose(0, 2, 1, 3)  # (B,H,L,dt)

    qh, kh, vh = split(qp), split(kp), split(vp)
    scores = jnp.einsum("bhqd,bhkd->bhqk", qh, kh) / math.sqrt(dt)
    attn = jax.nn.softmax(scores, axis=-1)
    ctx = jnp.einsum("bhqk,bhkd->bhqd", attn, vh)
    ctx = ctx.transpose(0, 2, 1, 3).reshape(B, L, D)
    return linear(ctx, params["wc"], params["bc"])


if __name__ == "__main__":
    d_model = 32
    n_head = 4
    batch = 2
    length = 8

    key = jax.random.PRNGKey(0)
    keys = jax.random.split(key, 11)

    # Deterministic synthetic parameters (Linear weights stored as [d_in, d_out]).
    s = 1.0 / math.sqrt(d_model)
    params = {
        "wq": jax.random.uniform(keys[0], (d_model, d_model), jnp.float32, -s, s),
        "bq": jax.random.uniform(keys[1], (d_model,), jnp.float32, -s, s),
        "wk": jax.random.uniform(keys[2], (d_model, d_model), jnp.float32, -s, s),
        "bk": jax.random.uniform(keys[3], (d_model,), jnp.float32, -s, s),
        "wv": jax.random.uniform(keys[4], (d_model, d_model), jnp.float32, -s, s),
        "bv": jax.random.uniform(keys[5], (d_model,), jnp.float32, -s, s),
        "wc": jax.random.uniform(keys[6], (d_model, d_model), jnp.float32, -s, s),
        "bc": jax.random.uniform(keys[7], (d_model,), jnp.float32, -s, s),
    }

    q = jax.random.normal(keys[8], (batch, length, d_model), jnp.float32)
    k = jax.random.normal(keys[9], (batch, length, d_model), jnp.float32)
    v = jax.random.normal(keys[10], (batch, length, d_model), jnp.float32)

    out = multi_head_attention(q, k, v, params, n_head)
    out = jax.block_until_ready(out)

    ref = reference_mha(q, k, v, params, n_head)
    assert out.shape == (batch, length, d_model)
    # Exact softmax divide -> f32-level agreement with the reference.
    assert jnp.allclose(out, ref, atol=2e-5, rtol=2e-5), "mismatch vs reference"

    print("KERNEL_OK")
</pallas_src>

<mosaic_0001>
module attributes {stable_mosaic.version = 11 : i64} {
  func.func @mha_kernel(%arg0: i32, %arg1: memref<16x32xf32, #tpu.memory_space<vmem>>, %arg2: memref<16x32xf32, #tpu.memory_space<vmem>>, %arg3: memref<16x32xf32, #tpu.memory_space<vmem>>, %arg4: memref<32x32xf32, #tpu.memory_space<vmem>>, %arg5: memref<1x32xf32, #tpu.memory_space<vmem>>, %arg6: memref<32x32xf32, #tpu.memory_space<vmem>>, %arg7: memref<1x32xf32, #tpu.memory_space<vmem>>, %arg8: memref<32x32xf32, #tpu.memory_space<vmem>>, %arg9: memref<1x32xf32, #tpu.memory_space<vmem>>, %arg10: memref<32x32xf32, #tpu.memory_space<vmem>>, %arg11: memref<1x32xf32, #tpu.memory_space<vmem>>, %arg12: memref<16x32xf32, #tpu.memory_space<vmem>>) attributes {dimension_semantics = [#tpu.dimension_semantics<parallel>], iteration_bounds = array<i64: 1>, scalar_prefetch = 0 : i64, scratch_operands = 0 : i64, tpu.core_type = #tpu.core_type<tc>, window_params = [{transform_indices = @transform_0, window_bounds = array<i64: 16, 32>}, {transform_indices = @transform_1, window_bounds = array<i64: 16, 32>}, {transform_indices = @transform_2, window_bounds = array<i64: 16, 32>}, {pipeline_mode = #tpu.pipeline_mode<synchronous>, transform_indices = @transform_3, window_bounds = array<i64: 32, 32>}, {pipeline_mode = #tpu.pipeline_mode<synchronous>, transform_indices = @transform_4, window_bounds = array<i64: 1, 32>}, {pipeline_mode = #tpu.pipeline_mode<synchronous>, transform_indices = @transform_5, window_bounds = array<i64: 32, 32>}, {pipeline_mode = #tpu.pipeline_mode<synchronous>, transform_indices = @transform_6, window_bounds = array<i64: 1, 32>}, {pipeline_mode = #tpu.pipeline_mode<synchronous>, transform_indices = @transform_7, window_bounds = array<i64: 32, 32>}, {pipeline_mode = #tpu.pipeline_mode<synchronous>, transform_indices = @transform_8, window_bounds = array<i64: 1, 32>}, {pipeline_mode = #tpu.pipeline_mode<synchronous>, transform_indices = @transform_9, window_bounds = array<i64: 32, 32>}, {pipeline_mode = #tpu.pipeline_mode<synchronous>, transform_indices = @transform_10, window_bounds = array<i64: 1, 32>}, {transform_indices = @transform_11, window_bounds = array<i64: 16, 32>}]} {
    %c0 = arith.constant 0 : index
    %c0_0 = arith.constant 0 : index
    %0 = vector.load %arg1[%c0, %c0_0] : memref<16x32xf32, #tpu.memory_space<vmem>>, vector<16x32xf32>
    %c0_1 = arith.constant 0 : index
    %c0_2 = arith.constant 0 : index
    %1 = vector.load %arg4[%c0_1, %c0_2] : memref<32x32xf32, #tpu.memory_space<vmem>>, vector<32x32xf32>
    %cst = arith.constant dense<0.000000e+00> : vector<16x32xf32>
    %2 = tpu.matmul %0, %1, %cst {dimension_numbers = #tpu.dot_dimension_numbers<[1], [0], [0], [1], [0, 0, 1, 1], [], []>} : vector<16x32xf32>, vector<32x32xf32>, vector<16x32xf32> -> vector<16x32xf32>
    %c0_3 = arith.constant 0 : index
    %c0_4 = arith.constant 0 : index
    %3 = vector.load %arg5[%c0_3, %c0_4] : memref<1x32xf32, #tpu.memory_space<vmem>>, vector<1x32xf32>
    %4 = vector.broadcast %3 : vector<1x32xf32> to vector<16x32xf32>
    %5 = arith.addf %2, %4 : vector<16x32xf32>
    %6 = vector.shape_cast %5 : vector<16x32xf32> to vector<2x8x4x8xf32>
    %7 = tpu.transpose %6, [0, 2, 1, 3] : vector<2x8x4x8xf32> -> vector<2x4x8x8xf32>
    %8 = vector.shape_cast %7 : vector<2x4x8x8xf32> to vector<8x8x8xf32>
    %c0_5 = arith.constant 0 : index
    %c0_6 = arith.constant 0 : index
    %9 = vector.load %arg2[%c0_5, %c0_6] : memref<16x32xf32, #tpu.memory_space<vmem>>, vector<16x32xf32>
    %c0_7 = arith.constant 0 : index
    %c0_8 = arith.constant 0 : index
    %10 = vector.load %arg6[%c0_7, %c0_8] : memref<32x32xf32, #tpu.memory_space<vmem>>, vector<32x32xf32>
    %cst_9 = arith.constant dense<0.000000e+00> : vector<16x32xf32>
    %11 = tpu.matmul %9, %10, %cst_9 {dimension_numbers = #tpu.dot_dimension_numbers<[1], [0], [0], [1], [0, 0, 1, 1], [], []>} : vector<16x32xf32>, vector<32x32xf32>, vector<16x32xf32> -> vector<16x32xf32>
    %c0_10 = arith.constant 0 : index
    %c0_11 = arith.constant 0 : index
    %12 = vector.load %arg7[%c0_10, %c0_11] : memref<1x32xf32, #tpu.memory_space<vmem>>, vector<1x32xf32>
    %13 = vector.broadcast %12 : vector<1x32xf32> to vector<16x32xf32>
    %14 = arith.addf %11, %13 : vector<16x32xf32>
    %15 = vector.shape_cast %14 : vector<16x32xf32> to vector<2x8x4x8xf32>
    %16 = tpu.transpose %15, [0, 2, 1, 3] : vector<2x8x4x8xf32> -> vector<2x4x8x8xf32>
    %17 = vector.shape_cast %16 : vector<2x4x8x8xf32> to vector<8x8x8xf32>
    %c0_12 = arith.constant 0 : index
    %c0_13 = arith.constant 0 : index
    %18 = vector.load %arg3[%c0_12, %c0_13] : memref<16x32xf32, #tpu.memory_space<vmem>>, vector<16x32xf32>
    %c0_14 = arith.constant 0 : index
    %c0_15 = arith.constant 0 : index
    %19 = vector.load %arg8[%c0_14, %c0_15] : memref<32x32xf32, #tpu.memory_space<vmem>>, vector<32x32xf32>
    %cst_16 = arith.constant dense<0.000000e+00> : vector<16x32xf32>
    %20 = tpu.matmul %18, %19, %cst_16 {dimension_numbers = #tpu.dot_dimension_numbers<[1], [0], [0], [1], [0, 0, 1, 1], [], []>} : vector<16x32xf32>, vector<32x32xf32>, vector<16x32xf32> -> vector<16x32xf32>
    %c0_17 = arith.constant 0 : index
    %c0_18 = arith.constant 0 : index
    %21 = vector.load %arg9[%c0_17, %c0_18] : memref<1x32xf32, #tpu.memory_space<vmem>>, vector<1x32xf32>
    %22 = vector.broadcast %21 : vector<1x32xf32> to vector<16x32xf32>
    %23 = arith.addf %20, %22 : vector<16x32xf32>
    %24 = vector.shape_cast %23 : vector<16x32xf32> to vector<2x8x4x8xf32>
    %25 = tpu.transpose %24, [0, 2, 1, 3] : vector<2x8x4x8xf32> -> vector<2x4x8x8xf32>
    %26 = vector.shape_cast %25 : vector<2x4x8x8xf32> to vector<8x8x8xf32>
    "tpu.trace_start"() <{level = 10 : i32, message = "gqt,gkt->gqk"}> : () -> ()
    %cst_19 = arith.constant dense<0.000000e+00> : vector<8x8x8xf32>
    %27 = tpu.matmul %8, %17, %cst_19 {dimension_numbers = #tpu.dot_dimension_numbers<[2], [2], [1], [1], [0, 0, 0, 1, 1, 1], [0], [0]>} : vector<8x8x8xf32>, vector<8x8x8xf32>, vector<8x8x8xf32> -> vector<8x8x8xf32>
    "tpu.trace_stop"() : () -> ()
    %cst_20 = arith.constant dense<0xFF800000> : vector<8x8xf32>
    %28 = vector.multi_reduction <maximumf>, %27, %cst_20 [2] : vector<8x8x8xf32> to vector<8x8xf32>
    %29 = vector.shape_cast %28 : vector<8x8xf32> to vector<8x8x1xf32>
    %30 = vector.broadcast %29 : vector<8x8x1xf32> to vector<8x8x8xf32>
    %31 = arith.subf %27, %30 : vector<8x8x8xf32>
    %32 = math.exp %31 : vector<8x8x8xf32>
    %cst_21 = arith.constant dense<0.000000e+00> : vector<8x8xf32>
    %33 = vector.multi_reduction <add>, %32, %cst_21 [2] : vector<8x8x8xf32> to vector<8x8xf32>
    %34 = vector.shape_cast %33 : vector<8x8xf32> to vector<8x8x1xf32>
    %35 = vector.broadcast %34 : vector<8x8x1xf32> to vector<8x8x8xf32>
    %36 = arith.divf %32, %35 : vector<8x8x8xf32>
    "tpu.trace_start"() <{level = 10 : i32, message = "gqk,gkt->gqt"}> : () -> ()
    %cst_22 = arith.constant dense<0.000000e+00> : vector<8x8x8xf32>
    %37 = tpu.matmul %36, %26, %cst_22 {dimension_numbers = #tpu.dot_dimension_numbers<[2], [1], [1], [2], [0, 0, 0, 1, 1, 2], [0], [0]>} : vector<8x8x8xf32>, vector<8x8x8xf32>, vector<8x8x8xf32> -> vector<8x8x8xf32>
    "tpu.trace_stop"() : () -> ()
    %38 = vector.shape_cast %37 : vector<8x8x8xf32> to vector<2x4x8x8xf32>
    %39 = tpu.transpose %38, [0, 2, 1, 3] : vector<2x4x8x8xf32> -> vector<2x8x4x8xf32>
    %40 = vector.shape_cast %39 : vector<2x8x4x8xf32> to vector<16x32xf32>
    %c0_23 = arith.constant 0 : index
    %c0_24 = arith.constant 0 : index
    %41 = vector.load %arg10[%c0_23, %c0_24] : memref<32x32xf32, #tpu.memory_space<vmem>>, vector<32x32xf32>
    %cst_25 = arith.constant dense<0.000000e+00> : vector<16x32xf32>
    %42 = tpu.matmul %40, %41, %cst_25 {dimension_numbers = #tpu.dot_dimension_numbers<[1], [0], [0], [1], [0, 0, 1, 1], [], []>} : vector<16x32xf32>, vector<32x32xf32>, vector<16x32xf32> -> vector<16x32xf32>
    %c0_26 = arith.constant 0 : index
    %c0_27 = arith.constant 0 : index
    %43 = vector.load %arg11[%c0_26, %c0_27] : memref<1x32xf32, #tpu.memory_space<vmem>>, vector<1x32xf32>
    %44 = vector.broadcast %43 : vector<1x32xf32> to vector<16x32xf32>
    %45 = arith.addf %42, %44 : vector<16x32xf32>
    %c0_28 = arith.constant 0 : index
    %c0_29 = arith.constant 0 : index
    %46 = vector.load %arg12[%c0_28, %c0_29] : memref<16x32xf32, #tpu.memory_space<vmem>>, vector<16x32xf32>
    tpu.vector_store %arg12[%c0_28, %c0_29], %45 {strides = array<i32>} : memref<16x32xf32, #tpu.memory_space<vmem>>, vector<16x32xf32>,
    return
  }
  func.func @transform_0(%arg0: i32) -> (i32, i32) {
    %c0_i32 = arith.constant 0 : i32
    %c0_i32_0 = arith.constant 0 : i32
    return %arg0, %c0_i32 : i32, i32
  }
  func.func @transform_1(%arg0: i32) -> (i32, i32) {
    %c0_i32 = arith.constant 0 : i32
    %c0_i32_0 = arith.constant 0 : i32
    return %arg0, %c0_i32 : i32, i32
  }
  func.func @transform_2(%arg0: i32) -> (i32, i32) {
    %c0_i32 = arith.constant 0 : i32
    %c0_i32_0 = arith.constant 0 : i32
    return %arg0, %c0_i32 : i32, i32
  }
  func.func @transform_3(%arg0: i32) -> (i32, i32) {
    %c0_i32 = arith.constant 0 : i32
    %c0_i32_0 = arith.constant 0 : i32
    %c0_i32_1 = arith.constant 0 : i32
    return %c0_i32, %c0_i32_0 : i32, i32
  }
  func.func @transform_4(%arg0: i32) -> (i32, i32) {
    %c0_i32 = arith.constant 0 : i32
    %c0_i32_0 = arith.constant 0 : i32
    %c0_i32_1 = arith.constant 0 : i32
    return %c0_i32, %c0_i32_0 : i32, i32
  }
  func.func @transform_5(%arg0: i32) -> (i32, i32) {
    %c0_i32 = arith.constant 0 : i32
    %c0_i32_0 = arith.constant 0 : i32
    %c0_i32_1 = arith.constant 0 : i32
    return %c0_i32, %c0_i32_0 : i32, i32
  }
  func.func @transform_6(%arg0: i32) -> (i32, i32) {
    %c0_i32 = arith.constant 0 : i32
    %c0_i32_0 = arith.constant 0 : i32
    %c0_i32_1 = arith.constant 0 : i32
    return %c0_i32, %c0_i32_0 : i32, i32
  }
  func.func @transform_7(%arg0: i32) -> (i32, i32) {
    %c0_i32 = arith.constant 0 : i32
    %c0_i32_0 = arith.constant 0 : i32
    %c0_i32_1 = arith.constant 0 : i32
    return %c0_i32, %c0_i32_0 : i32, i32
  }
  func.func @transform_8(%arg0: i32) -> (i32, i32) {
    %c0_i32 = arith.constant 0 : i32
    %c0_i32_0 = arith.constant 0 : i32
    %c0_i32_1 = arith.constant 0 : i32
    return %c0_i32, %c0_i32_0 : i32, i32
  }
  func.func @transform_9(%arg0: i32) -> (i32, i32) {
    %c0_i32 = arith.constant 0 : i32
    %c0_i32_0 = arith.constant 0 : i32
    %c0_i32_1 = arith.constant 0 : i32
    return %c0_i32, %c0_i32_0 : i32, i32
  }
  func.func @transform_10(%arg0: i32) -> (i32, i32) {
    %c0_i32 = arith.constant 0 : i32
    %c0_i32_0 = arith.constant 0 : i32
    %c0_i32_1 = arith.constant 0 : i32
    return %c0_i32, %c0_i32_0 : i32, i32
  }
  func.func @transform_11(%arg0: i32) -> (i32, i32) {
    %c0_i32 = arith.constant 0 : i32
    %c0_i32_0 = arith.constant 0 : i32
    return %arg0, %c0_i32 : i32, i32
  }
}

</mosaic_0001>

<bundles_post_ra>
// kernel: tpu_custom_call.1
= control target key start
LH: loop header
LB: loop body
LE: loop exit
PB: predicated region body
PF: predicated region fallthrough
CT: control target
= control target key end

     0   :  { %16 = vsyncpa [#allocation3], 0  ;;  %s3950_s0 = inlined_call_operand.hbm [shape: f32[16,32], index: 0, kind: input, shape index: {}]   ;;  %s3951_s1 = inlined_call_operand.hbm [shape: f32[16,32], index: 1, kind: input, shape index: {}]   ;;  %s3952_s2 = inlined_call_operand.hbm [shape: f32[16,32], index: 2, kind: input, shape index: {}]   ;;  %s3953_s3 = inlined_call_operand.hbm [shape: f32[32,32], index: 3, kind: input, shape index: {}]   ;;  %s3954_s4 = inlined_call_operand.vmem [shape: f32[1,32], index: 4, kind: input, shape index: {}]   ;;  %s3955_s5 = inlined_call_operand.hbm [shape: f32[32,32], index: 5, kind: input, shape index: {}]   ;;  %s3956_s6 = inlined_call_operand.vmem [shape: f32[1,32], index: 6, kind: input, shape index: {}]   ;;  %s3957_s7 = inlined_call_operand.hbm [shape: f32[32,32], index: 7, kind: input, shape index: {}]   ;;  %s3958_s8 = inlined_call_operand.vmem [shape: f32[1,32], index: 8, kind: input, shape index: {}]   ;;  %s3959_s9 = inlined_call_operand.hbm [shape: f32[32,32], index: 9, kind: input, shape index: {}]   ;;  %s3960_s10 = inlined_call_operand.vmem [shape: f32[1,32], index: 10, kind: input, shape index: {}]   ;;  %s3961_s11 = inlined_call_operand.hbm [shape: f32[16,32], index: 11, kind: output, shape index: {}]  }
   0x1   :  { %17 = vsyncpa [#allocation6], 0 }
   0x2   :  { %18 = vsyncpa [#allocation9], 0 }
   0x3   :  { %19 = vsyncpa [#allocation12], 0 }
   0x4   :  { %20 = vsyncpa [#allocation4], 0  ;;  %s3445_s17 = smov [#allocation5]   ;;  %s3446_s19 = smov [#allocation8]  }
   0x5   :  { %s38_s18 = sshll.u32 %s3445_s17, 4  ;;  %s62_s20 = sshll.u32 %s3446_s19, 4  ;;  %s39_s18 = int_to_ptr.vmem [resolvable:$true] %s38_s18  ;;  %s63_s20 = int_to_ptr.vmem [resolvable:$true] %s62_s20 }
   0x6   :  { %s3283_s21 = scalar_lea.vmem %s39_s18, 256  ;;  %p3288_p1 = scmp.lt.s32.totalorder %s39_s18, %s39_s18 }
   0x7   :  { %p3284_p0 = scmp.ne.s32.totalorder %s39_s18, %s3283_s21  ;;  %p3289_p2 = scmp.lt.s32.totalorder %s3283_s21, %s3283_s21 }
   0x9   :  { %p3290_p3 = por %p3289_p2, %p3288_p1 }
   0xb   :  { %p3291_p4 = pnand %p3290_p3, %p3284_p0 }
   0xd   :  { %3294 = shalt.err (!%p3291_p4)
}
   0xe   :  { %s3447_s22 = smov 128   ;;  %s3448_s23 = smov 8  }
   0xf   :  { %44 = dma.hbm_to_vmem [thread:$0]  %s3951_s1, 256, %s39_s18, [#allocation6], %s3447_s22, %s3447_s22, %s3448_s23  }
  0x10   :  { %s3303_s26 = scalar_lea.vmem %s63_s20, 512  ;;  %p3308_p6 = scmp.lt.s32.totalorder %s63_s20, %s63_s20 }
  0x11   :  { %p3304_p5 = scmp.ne.s32.totalorder %s63_s20, %s3303_s26  ;;  %p3309_p7 = scmp.lt.s32.totalorder %s3303_s26, %s3303_s26 }
  0x13   :  { %p3310_p8 = por %p3309_p7, %p3308_p6 }
  0x15   :  { %p3311_p9 = pnand %p3310_p8, %p3304_p5 }
  0x17   :  { %3314 = shalt.err (!%p3311_p9)
}
  0x18   :  { %68 = dma.hbm_to_vmem [thread:$0]  %s3953_s3, 512, %s63_s20, [#allocation9], %s3447_s22, %s3447_s22, %s3448_s23  }
  0x19   :  { %s3449_s29 = smov [#allocation11]   ;;  %s3450_s12 = smov [#allocation2]  }
  0x1a   :  { %s90_s30 = sshll.u32 %s3449_s29, 4  ;;  %s26_s13 = sshll.u32 %s3450_s12, 4  ;;  %s91_s30 = int_to_ptr.vmem [resolvable:$true] %s90_s30  ;;  %s27_s13 = int_to_ptr.vmem [resolvable:$true] %s26_s13 }
  0x1b   :  { %s3323_s1 = scalar_lea.vmem %s91_s30, 512  ;;  %p3328_p11 = scmp.lt.s32.totalorder %s91_s30, %s91_s30 }
  0x1c   :  { %p3324_p10 = scmp.ne.s32.totalorder %s91_s30, %s3323_s1  ;;  %p3329_p12 = scmp.lt.s32.totalorder %s3323_s1, %s3323_s1 }
  0x1e   :  { %p3330_p13 = por %p3329_p12, %p3328_p11 }
  0x20   :  { %p3331_p0 = pnand %p3330_p13, %p3324_p10 }
  0x22   :  { %3334 = shalt.err (!%p3331_p0)
}
  0x23   :  { %96 = dma.hbm_to_vmem [thread:$0]  %s3957_s7, 512, %s91_s30, [#allocation12], %s3447_s22, %s3447_s22, %s3448_s23  }
  0x24   :  { %s3343_s3 = scalar_lea.vmem %s27_s13, 256  ;;  %p3348_p2 = scmp.lt.s32.totalorder %s27_s13, %s27_s13 }
  0x25   :  { %p3344_p1 = scmp.ne.s32.totalorder %s27_s13, %s3343_s3  ;;  %p3349_p3 = scmp.lt.s32.totalorder %s3343_s3, %s3343_s3 }
  0x27   :  { %p3350_p4 = por %p3349_p3, %p3348_p2 }
  0x29   :  { %p3351_p5 = pnand %p3350_p4, %p3344_p1 }
  0x2b   :  { %3354 = shalt.err (!%p3351_p5)
}
  0x2c   :  { %32 = dma.hbm_to_vmem [thread:$0]  %s3950_s0, 256, %s27_s13, [#allocation3], %s3447_s22, %s3447_s22, %s3448_s23  }
  0x2d   :  { %s3451_s18 = smov [#allocation7]   ;;  %s3452_s20 = smov [#allocation10]  }
  0x2e   :  { %s50_s19 = sshll.u32 %s3451_s18, 4  ;;  %s76_s21 = sshll.u32 %s3452_s20, 4  ;;  %s51_s19 = int_to_ptr.vmem [resolvable:$true] %s50_s19  ;;  %s77_s21 = int_to_ptr.vmem [resolvable:$true] %s76_s21 }
  0x2f   :  { %s3363_s7 = scalar_lea.vmem %s51_s19, 256  ;;  %p3368_p7 = scmp.lt.s32.totalorder %s51_s19, %s51_s19 }
  0x30   :  { %p3364_p6 = scmp.ne.s32.totalorder %s51_s19, %s3363_s7  ;;  %p3369_p8 = scmp.lt.s32.totalorder %s3363_s7, %s3363_s7 }
  0x32   :  { %p3370_p9 = por %p3369_p8, %p3368_p7 }
  0x34   :  { %p3371_p10 = pnand %p3370_p9, %p3364_p6 }
  0x36   :  { %3374 = shalt.err (!%p3371_p10)
}
  0x37   :  { %56 = dma.hbm_to_vmem [thread:$0]  %s3952_s2, 256, %s51_s19, [#allocation6], %s3447_s22, %s3447_s22, %s3448_s23  }
  0x38   :  { %s3383_s0 = scalar_lea.vmem %s77_s21, 512  ;;  %p3388_p12 = scmp.lt.s32.totalorder %s77_s21, %s77_s21 }
  0x39   :  { %p3384_p11 = scmp.ne.s32.totalorder %s77_s21, %s3383_s0  ;;  %p3389_p13 = scmp.lt.s32.totalorder %s3383_s0, %s3383_s0 }
  0x3b   :  { %p3390_p0 = por %p3389_p13, %p3388_p12 }
  0x3d   :  { %p3391_p1 = pnand %p3390_p0, %p3384_p11 }
  0x3f   :  { %3394 = shalt.err (!%p3391_p1)
}
  0x40   :  { %82 = dma.hbm_to_vmem [thread:$0]  %s3955_s5, 512, %s77_s21, [#allocation9], %s3447_s22, %s3447_s22, %s3448_s23  }
  0x41   :  { %s3453_s28 = smov [#allocation13]  }
  0x42   :  { %s104_s29 = sshll.u32 %s3453_s28, 4  ;;  %s105_s29 = int_to_ptr.vmem [resolvable:$true] %s104_s29 }
  0x43   :  { %s3403_s30 = scalar_lea.vmem %s105_s29, 512  ;;  %p3408_p3 = scmp.lt.s32.totalorder %s105_s29, %s105_s29 }
  0x44   :  { %p3404_p2 = scmp.ne.s32.totalorder %s105_s29, %s3403_s30  ;;  %p3409_p4 = scmp.lt.s32.totalorder %s3403_s30, %s3403_s30 }
  0x46   :  { %p3410_p5 = por %p3409_p4, %p3408_p3 }
  0x48   :  { %p3411_p6 = pnand %p3410_p5, %p3404_p2 }
  0x4a   :  { %3414 = shalt.err (!%p3411_p6)
}
  0x4b   :  { %110 = dma.hbm_to_vmem [thread:$0]  %s3959_s9, 512, %s105_s29, [#allocation12], %s3447_s22, %s3447_s22, %s3448_s23  }
  0x4c   :  { %3435 = dma.done.wait [#allocation3], 256  }
  0x4d   :  { %3436 = vsyncadd [#allocation3], 4294967040 }
  0x4e   :  { %3437 = dma.done.wait [#allocation6], 512  }
  0x4f   :  { %3438 = vsyncadd [#allocation6], 4294966784 }
  0x50   :  { %3439 = dma.done.wait [#allocation9], 1024  }
  0x51   :  { %3440 = vsyncadd [#allocation9], 4294966272 }
  0x52   :  { %3441 = dma.done.wait [#allocation12], 1024  }
  0x53   :  { %3442 = vsyncadd [#allocation12], 4294966272  ;;  %v526_v0 = vld [vmem:[#allocation10 + $0x18] sm:$0xff]  ;;  %v525_v2 = vld [vmem:[#allocation10 + $0x10] sm:$0xff]  ;;  %vm147_vm0 = vcmask 261120   ;;  %s3454_s14 = smov 104   ;;  %v254_v31 = vlaneseq }
  0x54   :  { %v139_v1 = vld [vmem:[#allocation8 + $0x18] sm:$0xff]  ;;  %3111 = vmatprep.subr.mxu1 %v526_v0  ;;  %v138_v3 = vld [vmem:[#allocation8 + $0x10] sm:$0xff]  ;;  %v524_v4 = vld [vmem:[#allocation10 + $0x8] sm:$0xff]  ;;  %s3455_s15 = smov 120   ;;  %v3457_v22 = vmov 0.0   ;;  %vm3458_vm1 = vmmov 0  }
  0x55   :  { %3100 = vmatprep.subr.mxu0 %v139_v1  ;;  %3112 = vmatpush3.msra.mxu1 %v526_v0  ;;  %v137_v5 = vld [vmem:[#allocation8 + $0x8] sm:$0xff]  ;;  %v523_v6 = vld [vmem:[#allocation10] sm:$0xff]  ;;  %v134_v10 = vld [vmem:[#allocation2] sm:$0xff]  ;;  %v3459_v29 = vmov 1983009808   ;;  %v255_v35 = vshrl.u32 %v254_v31, 7 }
  0x56   :  { %3101 = vmatpush3.msra.mxu0 %v139_v1  ;;  %3113 = vmatprep.subr.mxu1 %v525_v2  ;;  %v521_v7 = vld [vmem:[#allocation5] sm:$0xff]  ;;  %v522_v9 = vld [vmem:[#allocation5 + $0x8] sm:$0xff]  ;;  %v135_v11 = vld [vmem:[#allocation2 + $0x8] sm:$0xff]  ;;  %v252_v30 = vunpack.c.l.s4 %v3459_v29  ;;  %v3460_v32 = vmov 1934713408   ;;  %vm1293_vm2 = vcmask 64512  }
  0x57   :  { %3102 = vmatprep.subr.mxu0 %v138_v3  ;;  %3114 = vmatpush3.msra.mxu1 %v525_v2  ;;  %v136_v8 = vld [vmem:[#allocation8] sm:$0xff]  ;;  %v2999_v13 = vld [vmem:[%s3956_s6] ss:$0 sm:$0xff]  ;;  %s3456_s6 = smov 112   ;;  %v912_v23 = vld [vmem:[#allocation11 + $0x18] sm:$0xff]  ;;  %v284_v33 = vunpack.c.l.s4 %v3460_v32  ;;  %s3462_s16 = smov 24  }
  0x58   :  { %3103 = vmatpush3.msra.mxu0 %v138_v3  ;;  %3115 = vmatprep.subr.mxu1 %v524_v4  ;;  %v2992_v17 = vld [vmem:[%s3954_s4] ss:$0 sm:$0xff]  ;;  %v910_v25 = vld [vmem:[#allocation11 + $0x8] sm:$0xff]  ;;  %v909_v26 = vld [vmem:[#allocation11] sm:$0xff]  ;;  %v253_v34 = vunpack.c.0.s8 %v252_v30  ;;  %vm2872_vm3 = vcmask 130048   ;;  %vm2875_vm4 = vcmask 195584  }
  0x59   :  { %3104 = vmatprep.subr.mxu0 %v137_v5  ;;  %3116 = vmatpush3.msra.mxu1 %v524_v4  ;;  %v911_v24 = vld [vmem:[#allocation11 + $0x10] sm:$0xff]  ;;  %v908_v28 = vld [vmem:[#allocation7 + $0x8] sm:$0xff]  ;;  %v285_v38 = vunpack.c.0.s8 %v284_v33  ;;  %s3463_s19 = smov [#allocation14]  }
  0x5a   :  { %3105 = vmatpush3.msra.mxu0 %v137_v5  ;;  %3117 = vmatprep.subr.mxu1 %v523_v6  ;;  %v907_v27 = vld [vmem:[#allocation7] sm:$0xff]  ;;  %v3616_v39 = vsub.s32 %v253_v34, %v255_v35  ;;  %s2977_s20 = sshll.u32 %s3463_s19, 4  ;;  %s2978_s20 = int_to_ptr.vmem [resolvable:$true] %s2977_s20 }
  0x5b   :  { %3119 = vmatprep.mubr.msk.f32.mxu1 %vm147_vm0, %v521_v7  ;;  %3118 = vmatpush3.msra.mxu1 %v523_v6  ;;  %v3620_v46 = vsub.s32 %v285_v38, %v255_v35  ;;  %s3415_s21 = scalar_lea.vmem %s2978_s20, 256  ;;  %p3420_p8 = scmp.lt.s32.totalorder %s2978_s20, %s2978_s20 }
  0x5c   :  { %3106 = vmatprep.subr.mxu0 %v136_v8  ;;  %3120 = vmatmul.mubr.msk.f32.vlgmr.msra.gmra.mxu1 %vm147_vm0, %v522_v9  ;;  %p3416_p7 = scmp.ne.s32.totalorder %s2978_s20, %s3415_s21  ;;  %p3421_p9 = scmp.lt.s32.totalorder %s3415_s21, %s3415_s21 }
  0x5d   :  { %3107 = vmatpush3.msra.mxu0 %v136_v8  ;;  %3108 = vmatprep.mubr.msk.f32.mxu0 %vm147_vm0, %v134_v10 }
  0x5e   :  { %3109 = vmatmul.mubr.msk.f32.vlgmr.msra.gmra.mxu0 %vm147_vm0, %v135_v11  ;;  %3133 = vmatprep.subr.mxu1 %v3457_v22  ;;  %p3422_p10 = por %p3421_p9, %p3420_p8 }
  0x5f   :  { %3122 = vmatprep.subr.mxu0 %v912_v23  ;;  %3135 = vmatprep.mubr.msk.f32.mxu1 %vm3458_vm1, %v3457_v22 }
  0x60   :  { %3123 = vmatpush3.msra.mxu0 %v912_v23  ;;  %3130 = vmatprep.mubr.msk.f32.mxu0 %vm147_vm0, %v907_v27  ;;  %p3423_p11 = pnand %p3422_p10, %p3416_p7 }
  0x61   :  { %3124 = vmatprep.subr.mxu0 %v911_v24 }
  0x62   :  { %3125 = vmatpush3.msra.mxu0 %v911_v24 }
  0x63   :  { %3126 = vmatprep.subr.mxu0 %v910_v25 }
  0x64   :  { %3127 = vmatpush3.msra.mxu0 %v910_v25 }
  0x65   :  { %3128 = vmatprep.subr.mxu0 %v909_v26 }
  0x66   :  { %3129 = vmatpush3.msra.mxu0 %v909_v26 }
  0x67   :  { %3153 = vmatprep.subr.mxu0 %v3457_v22  ;;  %3131 = vmatmul.mubr.msk.f32.vlgmr.msra.gmra.mxu0 %vm147_vm0, %v908_v28 }
  0x68   :  { %3155 = vmatprep.mubr.msk.f32.mxu0 %vm3458_vm1, %v3457_v22 }
 0x11c   :  { %v3121_v12 = vpop.f32.mrf.mxu1 }
 0x11d   :  { %v3592_v20 = vadd.f32 %v3121_v12, %v2999_v13 }
 0x11e   :  { %v3110_v14 = vpop.f32.mrf.mxu0  ;;  %v606_v15 = vpop.f32.mrf.mxu1 }
 0x11f   :  { %v3573_v16 = vadd.f32 %v2999_v13, %v606_v15  ;;  %v3598_v21 = vadd.f32 %v3110_v14, %v2992_v17 }
 0x120   :  { %v220_v18 = vpop.f32.mrf.mxu0 }
 0x121   :  { %629 = vrot.lane.b32.xlu1 %v3573_v16, %s3454_s14  ;;  %617 = vrot.lane.b32.xlu0 %v3573_v16, %s3455_s15  ;;  %v3582_v19 = vadd.f32 %v2992_v17, %v220_v18 }
 0x125   :  { %623 = vrot.lane.b32.xlu0 %v3573_v16, %s3456_s6  ;;  %231 = vrot.lane.b32.xlu1 %v3582_v19, %s3455_s15 }
 0x129   :  { %237 = vrot.lane.b32.xlu0 %v3582_v19, %s3456_s6  ;;  %243 = vrot.lane.b32.xlu1 %v3582_v19, %s3454_s14 }
 0x12d   :  { %619 = vrot.lane.b32.xlu0 %v3592_v20, %s3455_s15  ;;  %625 = vrot.lane.b32.xlu1 %v3592_v20, %s3456_s6 }
 0x131   :  { %631 = vrot.lane.b32.xlu0 %v3592_v20, %s3454_s14  ;;  %233 = vrot.lane.b32.xlu1 %v3598_v21, %s3455_s15 }
 0x135   :  { %239 = vrot.lane.b32.xlu0 %v3598_v21, %s3456_s6  ;;  %245 = vrot.lane.b32.xlu1 %v3598_v21, %s3454_s14 }
 0x193   :  { %v630_v36 = vpop.permute.xlu1 %629  ;;  %v618_v37 = vpop.permute.xlu0 %617 }
 0x194   :  { %v651_v40 = vcombine.low %v618_v37, %v630_v36  ;;  %v652_v41 = vcombine.high %v618_v37, %v630_v36 }
 0x196   :  { %v659_v47 = vrot.slane %v651_v40, %v3616_v39  ;;  %v666_v48 = vrot.slane %v652_v41, %v3616_v39 }
 0x197   :  { %v624_v42 = vpop.permute.xlu0 %623  ;;  %v232_v43 = vpop.permute.xlu1 %231 }
 0x198   :  { %v635_v44 = vcombine.low %v3573_v16, %v624_v42  ;;  %v636_v45 = vcombine.high %v3573_v16, %v624_v42 }
 0x19a   :  { %v643_v49 = vrot.slane %v635_v44, %v3616_v39  ;;  %v650_v50 = vrot.slane %v636_v45, %v3616_v39 }
 0x19b   :  { %v238_v51 = vpop.permute.xlu0 %237  ;;  %v244_v52 = vpop.permute.xlu1 %243 }
 0x19c   :  { %v667_v53 = vcombine.low %v643_v49, %v659_v47  ;;  %v668_v54 = vcombine.high %v643_v49, %v659_v47  ;;  %v683_v55 = vcombine.low %v650_v50, %v666_v48  ;;  %v684_v56 = vcombine.high %v650_v50, %v666_v48 }
 0x19d   :  { %v249_v57 = vcombine.low %v3582_v19, %v238_v51  ;;  %v250_v58 = vcombine.high %v3582_v19, %v238_v51  ;;  %v265_v59 = vcombine.low %v232_v43, %v244_v52  ;;  %v266_v60 = vcombine.high %v232_v43, %v244_v52 }
 0x19e   :  { %v675_v61 = vrot.slane %v667_v53, %v3620_v46  ;;  %v682_v62 = vrot.slane %v668_v54, %v3620_v46  ;;  %v691_v63 = vrot.slane %v683_v55, %v3620_v46  ;;  %v698_v0 = vrot.slane %v684_v56, %v3620_v46 }
 0x19f   :  { %v257_v1 = vrot.slane %v249_v57, %v3616_v39  ;;  %v264_v2 = vrot.slane %v250_v58, %v3616_v39  ;;  %v273_v3 = vrot.slane %v265_v59, %v3616_v39  ;;  %v280_v4 = vrot.slane %v266_v60, %v3616_v39  ;;  %v620_v5 = vpop.permute.xlu0 %619  ;;  %v626_v6 = vpop.permute.xlu1 %625 }
 0x1a0   :  { %v771_v7 = vcombine.low %v675_v61, %v682_v62  ;;  %v3002_v8 = vcombine.high %v675_v61, %v682_v62  ;;  %v787_v9 = vcombine.low %v691_v63, %v698_v0  ;;  %v3003_v10 = vcombine.high %v691_v63, %v698_v0 }
 0x1a1   :  { %v281_v11 = vcombine.low %v257_v1, %v273_v3  ;;  %v282_v12 = vcombine.high %v257_v1, %v273_v3  ;;  %v297_v13 = vcombine.low %v264_v2, %v280_v4  ;;  %v298_v14 = vcombine.high %v264_v2, %v280_v4 }
 0x1a2   :  { %v3641_v24 = vrot.slane %v771_v7, %v3616_v39  ;;  %v3644_v25 = vrot.slane %v3002_v8, %v3616_v39  ;;  %v3647_v26 = vrot.slane %v787_v9, %v3616_v39  ;;  %v3650_v27 = vrot.slane %v3003_v10, %v3616_v39 }
 0x1a3   :  { %v289_v15 = vrot.slane %v281_v11, %v3620_v46  ;;  %v296_v16 = vrot.slane %v282_v12, %v3620_v46  ;;  %v305_v17 = vrot.slane %v297_v13, %v3620_v46  ;;  %v312_v18 = vrot.slane %v298_v14, %v3620_v46  ;;  %v632_v19 = vpop.permute.xlu0 %631  ;;  %v234_v23 = vpop.permute.xlu1 %233 }
 0x1a4   :  { %v703_v32 = vcombine.low %v3592_v20, %v626_v6  ;;  %v704_v33 = vcombine.high %v3592_v20, %v626_v6  ;;  %v719_v34 = vcombine.low %v620_v5, %v632_v19  ;;  %v720_v35 = vcombine.high %v620_v5, %v632_v19 }
 0x1a5   :  { %v385_v28 = vcombine.low %v289_v15, %v296_v16  ;;  %v2995_v29 = vcombine.high %v289_v15, %v296_v16  ;;  %v401_v30 = vcombine.low %v305_v17, %v312_v18  ;;  %v2996_v31 = vcombine.high %v305_v17, %v312_v18 }
 0x1a6   :  { %v711_v41 = vrot.slane %v703_v32, %v3616_v39  ;;  %v718_v42 = vrot.slane %v704_v33, %v3616_v39  ;;  %v727_v20 = vrot.slane %v719_v34, %v3616_v39  ;;  %v734_v43 = vrot.slane %v720_v35, %v3616_v39 }
 0x1a7   :  { %v3655_v36 = vrot.slane %v385_v28, %v3616_v39  ;;  %v3658_v37 = vrot.slane %v2995_v29, %v3616_v39  ;;  %v3661_v38 = vrot.slane %v401_v30, %v3616_v39  ;;  %v3664_v40 = vrot.slane %v2996_v31, %v3616_v39  ;;  %v240_v44 = vpop.permute.xlu0 %239  ;;  %v246_v45 = vpop.permute.xlu1 %245 }
 0x1a8   :  { %v803_v47 = vcombine.low %v3641_v24, %v3644_v25  ;;  %v819_v48 = vcombine.low %v3647_v26, %v3650_v27  ;;  %v735_v51 = vcombine.low %v711_v41, %v727_v20  ;;  %v736_v52 = vcombine.high %v711_v41, %v727_v20 }
 0x1a9   :  { %v417_v49 = vcombine.low %v3655_v36, %v3658_v37  ;;  %v433_v50 = vcombine.low %v3661_v38, %v3664_v40  ;;  %v751_v53 = vcombine.low %v718_v42, %v734_v43  ;;  %v752_v54 = vcombine.high %v718_v42, %v734_v43 }
 0x1aa   :  { %v317_v55 = vcombine.low %v3598_v21, %v240_v44  ;;  %v318_v56 = vcombine.high %v3598_v21, %v240_v44  ;;  %v333_v57 = vcombine.low %v234_v23, %v246_v45  ;;  %v334_v58 = vcombine.high %v234_v23, %v246_v45 }
 0x1ab   :  { %v743_v59 = vrot.slane %v735_v51, %v3620_v46  ;;  %v750_v60 = vrot.slane %v736_v52, %v3620_v46  ;;  %v759_v61 = vrot.slane %v751_v53, %v3620_v46  ;;  %v766_v62 = vrot.slane %v752_v54, %v3620_v46 }
 0x1ac   :  { %v325_v63 = vrot.slane %v317_v55, %v3616_v39  ;;  %v332_v0 = vrot.slane %v318_v56, %v3616_v39  ;;  %v341_v1 = vrot.slane %v333_v57, %v3616_v39  ;;  %v348_v2 = vrot.slane %v334_v58, %v3616_v39 }
 0x1ad   :  { %v839_v3 = vcombine.low %v743_v59, %v750_v60  ;;  %v3004_v21 = vcombine.high %v743_v59, %v750_v60  ;;  %v855_v4 = vcombine.low %v759_v61, %v766_v62  ;;  %v3005_v5 = vcombine.high %v759_v61, %v766_v62 }
 0x1ae   :  { %v349_v6 = vcombine.low %v325_v63, %v341_v1  ;;  %v350_v7 = vcombine.high %v325_v63, %v341_v1  ;;  %v365_v8 = vcombine.low %v332_v0, %v348_v2  ;;  %v366_v9 = vcombine.high %v332_v0, %v348_v2 }
 0x1af   :  { %v846_v10 = vrot.slane %v839_v3, %v3616_v39  ;;  %v854_v11 = vrot.slane %v3004_v21, %v3616_v39  ;;  %v862_v12 = vrot.slane %v855_v4, %v3616_v39  ;;  %v870_v13 = vrot.slane %v3005_v5, %v3616_v39 }
 0x1b0   :  { %v357_v14 = vrot.slane %v349_v6, %v3620_v46  ;;  %v364_v15 = vrot.slane %v350_v7, %v3620_v46  ;;  %v373_v16 = vrot.slane %v365_v8, %v3620_v46  ;;  %v380_v17 = vrot.slane %v366_v9, %v3620_v46  ;;  %v3006_v9 = vld [vmem:[%s3958_s8] ss:$0 sm:$0xff]  ;;  %s3461_s8 = smov 16  }
 0x1b1   :  { %v871_v18 = vcombine.low %v846_v10, %v854_v11  ;;  %v887_v19 = vcombine.low %v862_v12, %v870_v13  ;;  %v811_v31 = vrot.slane %v803_v47, %v3620_v46  ;;  %v827_v32 = vrot.slane %v819_v48, %v3620_v46 }
 0x1b2   :  { %v453_v23 = vcombine.low %v357_v14, %v364_v15  ;;  %v2997_v28 = vcombine.high %v357_v14, %v364_v15  ;;  %v469_v29 = vcombine.low %v373_v16, %v380_v17  ;;  %v2998_v30 = vcombine.high %v373_v16, %v380_v17 }
 0x1b3   :  { %v425_v33 = vrot.slane %v417_v49, %v3620_v46  ;;  %v441_v34 = vrot.slane %v433_v50, %v3620_v46  ;;  %v804_v43 = vcombine.high %v3641_v24, %v3644_v25  ;;  %v820_v44 = vcombine.high %v3647_v26, %v3650_v27 }
 0x1b4   :  { %v460_v35 = vrot.slane %v453_v23, %v3616_v39  ;;  %v468_v41 = vrot.slane %v2997_v28, %v3616_v39  ;;  %v476_v42 = vrot.slane %v469_v29, %v3616_v39  ;;  %v484_v20 = vrot.slane %v2998_v30, %v3616_v39 }
 0x1b5   :  { %v835_v45 = vcombine.low %v811_v31, %v827_v32  ;;  %v449_v49 = vcombine.low %v425_v33, %v441_v34  ;;  %v418_v50 = vcombine.high %v3655_v36, %v3658_v37  ;;  %v434_v51 = vcombine.high %v3661_v38, %v3664_v40 }
 0x1b6   :  { %v485_v47 = vcombine.low %v460_v35, %v468_v41  ;;  %v501_v48 = vcombine.low %v476_v42, %v484_v20  ;;  %v872_v52 = vcombine.high %v846_v10, %v854_v11  ;;  %v888_v53 = vcombine.high %v862_v12, %v870_v13  ;;  %v3132_v10 = vpop.f32.mrf.mxu0 }
 0x1b7   :  { %3134 = vmatpush3.xpose.msk.msra.mxu1 %vm1293_vm2, %v835_v45  ;;  %v879_v24 = vrot.slane %v871_v18, %v3620_v46  ;;  %v895_v25 = vrot.slane %v887_v19, %v3620_v46  ;;  %v836_v54 = vcombine.high %v811_v31, %v827_v32  ;;  %v818_v36 = vrot.slane %v804_v43, %v3620_v46 }
 0x1b8   :  { %3138 = vmatprep.subr.mxu1 %v3457_v22  ;;  %v493_v26 = vrot.slane %v485_v47, %v3620_v46  ;;  %v509_v27 = vrot.slane %v501_v48, %v3620_v46  ;;  %v834_v37 = vrot.slane %v820_v44, %v3620_v46  ;;  %v486_v38 = vcombine.high %v460_v35, %v468_v41  ;;  %v992_v16 = vpop.f32.mrf.mxu0 }
 0x1b9   :  { %v502_v40 = vcombine.high %v476_v42, %v484_v20  ;;  %v903_v55 = vcombine.low %v879_v24, %v895_v25  ;;  %v450_v56 = vcombine.high %v425_v33, %v441_v34  ;;  %v886_v57 = vrot.slane %v872_v52, %v3620_v46 }
 0x1ba   :  { %3136 = vmatmul.mubr.msk.f32.vlgmr.msra.gmra.mxu1 %vm1293_vm2, %v449_v49  ;;  %v902_v58 = vrot.slane %v888_v53, %v3620_v46  ;;  %v432_v59 = vrot.slane %v418_v50, %v3620_v46  ;;  %v448_v60 = vrot.slane %v434_v51, %v3620_v46  ;;  %v517_v61 = vcombine.low %v493_v26, %v509_v27 }
 0x1bb   :  { %3139 = vmatpush3.xpose.msk.msra.mxu1 %vm1293_vm2, %v836_v54  ;;  %3140 = vmatprep.mubr.msk.f32.mxu1 %vm3458_vm1, %v3457_v22  ;;  %v837_v62 = vcombine.low %v818_v36, %v834_v37  ;;  %v500_v63 = vrot.slane %v486_v38, %v3620_v46  ;;  %v516_v0 = vrot.slane %v502_v40, %v3620_v46 }
 0x1bc   :  { %3143 = vmatprep.subr.mxu1 %v3457_v22  ;;  %3154 = vmatpush3.xpose.msk.msra.mxu0 %vm1293_vm2, %v903_v55  ;;  %v905_v1 = vcombine.low %v886_v57, %v902_v58  ;;  %v451_v2 = vcombine.low %v432_v59, %v448_v60  ;;  %v838_v3 = vcombine.high %v818_v36, %v834_v37 }
 0x1bd   :  { %3163 = vmatprep.subr.mxu0 %v3457_v22  ;;  %v519_v21 = vcombine.low %v500_v63, %v516_v0  ;;  %v452_v4 = vcombine.high %v432_v59, %v448_v60  ;;  %v904_v5 = vcombine.high %v879_v24, %v895_v25  ;;  %v518_v6 = vcombine.high %v493_v26, %v509_v27 }
 0x1be   :  { %3141 = vmatmul.mubr.msk.f32.vlgmr.msra.gmra.mxu1 %vm1293_vm2, %v450_v56  ;;  %v906_v7 = vcombine.high %v886_v57, %v902_v58  ;;  %v520_v8 = vcombine.high %v500_v63, %v516_v0  ;;  %v3767_v11 = vadd.f32 %v3132_v10, %v3006_v9  ;;  %v993_v49 = vadd.f32 %v3006_v9, %v992_v16 }
 0x1bf   :  { %3144 = vmatpush3.xpose.msk.msra.mxu1 %vm1293_vm2, %v837_v62  ;;  %3145 = vmatprep.mubr.msk.f32.mxu1 %vm3458_vm1, %v3457_v22 }
 0x1c0   :  { %3148 = vmatprep.subr.mxu1 %v3457_v22  ;;  %3156 = vmatmul.mubr.msk.f32.vlgmr.msra.gmra.mxu0 %vm1293_vm2, %v517_v61 }
 0x1c1   :  { %3164 = vmatpush3.xpose.msk.msra.mxu0 %vm1293_vm2, %v905_v1  ;;  %3165 = vmatprep.mubr.msk.f32.mxu0 %vm3458_vm1, %v3457_v22 }
 0x1c2   :  { %3146 = vmatmul.mubr.msk.f32.vlgmr.msra.gmra.mxu1 %vm1293_vm2, %v451_v2  ;;  %3173 = vmatprep.subr.mxu0 %v3457_v22 }
 0x1c3   :  { %3149 = vmatpush3.xpose.msk.msra.mxu1 %vm1293_vm2, %v838_v3  ;;  %3150 = vmatprep.mubr.msk.f32.mxu1 %vm3458_vm1, %v3457_v22 }
 0x1c4   :  { %3158 = vmatprep.subr.mxu1 %v3457_v22  ;;  %3166 = vmatmul.mubr.msk.f32.vlgmr.msra.gmra.mxu0 %vm1293_vm2, %v519_v21 }
 0x1c5   :  { %3175 = vmatprep.mubr.msk.f32.mxu0 %vm3458_vm1, %v3457_v22 }
 0x1c6   :  { %3151 = vmatmul.mubr.msk.f32.vlgmr.msra.gmra.mxu1 %vm1293_vm2, %v452_v4 }
 0x1c7   :  { %3159 = vmatpush3.xpose.msk.msra.mxu1 %vm1293_vm2, %v904_v5  ;;  %3160 = vmatprep.mubr.msk.f32.mxu1 %vm3458_vm1, %v3457_v22 }
 0x1c8   :  { %3168 = vmatprep.subr.mxu1 %v3457_v22 }
 0x1ca   :  { %3161 = vmatmul.mubr.msk.f32.vlgmr.msra.gmra.mxu1 %vm1293_vm2, %v518_v6 }
 0x1cb   :  { %3169 = vmatpush3.xpose.msk.msra.mxu1 %vm1293_vm2, %v906_v7  ;;  %3170 = vmatprep.mubr.msk.f32.mxu1 %vm3458_vm1, %v3457_v22 }
 0x1cc   :  { %3178 = vmatprep.subr.mxu1 %v3457_v22 }
 0x1ce   :  { %3171 = vmatmul.mubr.msk.f32.vlgmr.msra.gmra.mxu1 %vm1293_vm2, %v520_v8 }
 0x1cf   :  { %3180 = vmatprep.mubr.msk.f32.mxu1 %vm3458_vm1, %v3457_v22 }
 0x27a   :  { %v1366_v12 = vpop.f32.mrf.mxu1 }
 0x27b   :  { %v1902_v13 = vsel %vm1293_vm2, %v1366_v12, -inf }
 0x27c   :  { %1903 = vmax.xlane.f32.xlu0 %v1902_v13  ;;  %v3137_v14 = vpop.f32.mrf.mxu1 }
 0x27e   :  { %v1442_v15 = vpop.f32.mrf.mxu1 }
 0x27f   :  { %v1905_v42 = vsel %vm1293_vm2, %v1442_v15, -inf }
 0x280   :  { %v3142_v17 = vpop.f32.mrf.mxu1  ;;  %v1670_v18 = vpop.f32.mrf.mxu0 }
 0x281   :  { %v1914_v19 = vsel %vm1293_vm2, %v1670_v18, -inf }
 0x282   :  { %v1518_v23 = vpop.f32.mrf.mxu1  ;;  %1915 = vmax.xlane.f32.xlu1 %v1914_v19  ;;  %v3157_v28 = vpop.f32.mrf.mxu0 }
 0x283   :  { %v1908_v29 = vsel %vm1293_vm2, %v1518_v23, -inf }
 0x284   :  { %1909 = vmax.xlane.f32.xlu0 %v1908_v29  ;;  %v3147_v30 = vpop.f32.mrf.mxu1  ;;  %v1822_v31 = vpop.f32.mrf.mxu0 }
 0x285   :  { %v1920_v32 = vsel %vm1293_vm2, %v1822_v31, -inf }
 0x286   :  { %v1594_v33 = vpop.f32.mrf.mxu1  ;;  %1921 = vmax.xlane.f32.xlu1 %v1920_v32  ;;  %v3167_v34 = vpop.f32.mrf.mxu0 }
 0x287   :  { %v1911_v35 = vsel %vm1293_vm2, %v1594_v33, -inf }
 0x288   :  { %1912 = vmax.xlane.f32.xlu0 %v1911_v35  ;;  %v3152_v41 = vpop.f32.mrf.mxu1 }
 0x28a   :  { %v1746_v20 = vpop.f32.mrf.mxu1  ;;  %1906 = vmax.xlane.f32.xlu1 %v1905_v42 }
 0x28b   :  { %v1917_v43 = vsel %vm1293_vm2, %v1746_v20, -inf }
 0x28c   :  { %1918 = vmax.xlane.f32.xlu0 %v1917_v43  ;;  %v3162_v44 = vpop.f32.mrf.mxu1 }
 0x28e   :  { %v1898_v45 = vpop.f32.mrf.mxu1 }
 0x28f   :  { %v1923_v47 = vsel %vm1293_vm2, %v1898_v45, -inf }
 0x290   :  { %1924 = vmax.xlane.f32.xlu0 %v1923_v47  ;;  %v3172_v48 = vpop.f32.mrf.mxu1 }
 0x29b   :  { %1003 = vrot.lane.b32.xlu1 %v993_v49, %s3455_s15 }
 0x29f   :  { %1015 = vrot.lane.b32.xlu1 %v993_v49, %s3454_s14 }
 0x2a6   :  { %1009 = vrot.lane.b32.xlu0 %v993_v49, %s3456_s6 }
 0x305   :  { %v1904_v50 = vpop.xlane.xlu0 %1903 }
 0x306   :  { %v1926_v51 = vsub.f32 %v1366_v12, %v1904_v50 }
 0x308   :  { %v1934_v26 = vmul.f32 1.442695, %v1926_v51 }
 0x30b   :  { %v1916_v52 = vpop.xlane.xlu1 %1915 }
 0x30c   :  { %v1930_v53 = vsub.f32 %v1670_v18, %v1916_v52 }
 0x30d   :  { %v1910_v24 = vpop.xlane.xlu0 %1909 }
 0x30e   :  { %v1942_v25 = vmul.f32 1.442695, %v1930_v53  ;;  %v1928_v37 = vsub.f32 %v1518_v23, %v1910_v24 }
 0x30f   :  { %v1922_v27 = vpop.xlane.xlu1 %1921 }
 0x310   :  { %3243 = vpow2.f32 %v1942_v25  ;;  %v1932_v54 = vsub.f32 %v1822_v31, %v1922_v27  ;;  %v1938_v59 = vmul.f32 1.442695, %v1928_v37 }
 0x311   :  { %v1913_v36 = vpop.xlane.xlu0 %1912  ;;  %3245 = vpow2.f32 %v1934_v26 }
 0x312   :  { %v1946_v38 = vmul.f32 1.442695, %v1932_v54  ;;  %v1929_v55 = vsub.f32 %v1594_v33, %v1913_v36 }
 0x313   :  { %v1907_v40 = vpop.xlane.xlu1 %1906 }
 0x314   :  { %v1927_v56 = vsub.f32 %v1442_v15, %v1907_v40  ;;  %3247 = vpow2.f32 %v1946_v38  ;;  %v1940_v61 = vmul.f32 1.442695, %v1929_v55 }
 0x315   :  { %v1919_v57 = vpop.xlane.xlu0 %1918 }
 0x316   :  { %v1936_v58 = vmul.f32 1.442695, %v1927_v56  ;;  %v1931_v62 = vsub.f32 %v1746_v20, %v1919_v57 }
 0x317   :  { %v1004_v60 = vpop.permute.xlu1 %1003 }
 0x318   :  { %3249 = vpow2.f32 %v1936_v58  ;;  %v1944_v2 = vmul.f32 1.442695, %v1931_v62 }
 0x319   :  { %v1925_v63 = vpop.xlane.xlu0 %1924  ;;  %3251 = vpow2.f32 %v1938_v59 }
 0x31a   :  { %v1933_v0 = vsub.f32 %v1898_v45, %v1925_v63  ;;  %3253 = vpow2.f32 %v1940_v61 }
 0x31b   :  { %v1016_v1 = vpop.permute.xlu1 %1015  ;;  %3255 = vpow2.f32 %v1944_v2 }
 0x31c   :  { %v1037_v3 = vcombine.low %v1004_v60, %v1016_v1  ;;  %v1038_v21 = vcombine.high %v1004_v60, %v1016_v1  ;;  %v1948_v9 = vmul.f32 1.442695, %v1933_v0 }
 0x31d   :  { %v3780_v4 = vpop.eup %3243  ;;  %v1010_v5 = vpop.permute.xlu0 %1009 }
 0x31e   :  { %v1021_v6 = vcombine.low %v993_v49, %v1010_v5  ;;  %v1022_v7 = vcombine.high %v993_v49, %v1010_v5  ;;  %v1045_v8 = vrot.slane %v1037_v3, %v3616_v39  ;;  %v1052_v10 = vrot.slane %v1038_v21, %v3616_v39  ;;  %v3786_v13 = vpop.eup %3245 }
 0x31f   :  { %v1962_v12 = vsel %vm1293_vm2, %v3780_v4, 0.0  ;;  %3257 = vpow2.f32 %v1948_v9  ;;  %v1950_v23 = vsel %vm1293_vm2, %v3786_v13, 0.0 }
 0x320   :  { %v1029_v14 = vrot.slane %v1021_v6, %v3616_v39  ;;  %v1036_v15 = vrot.slane %v1022_v7, %v3616_v39  ;;  %1963 = vadd.xlane.f32.xlu1 %v1962_v12 }
 0x321   :  { %v3792_v28 = vpop.eup %3247 }
 0x322   :  { %v1053_v16 = vcombine.low %v1029_v14, %v1045_v8  ;;  %v1054_v17 = vcombine.high %v1029_v14, %v1045_v8  ;;  %v1069_v18 = vcombine.low %v1036_v15, %v1052_v10  ;;  %v1070_v19 = vcombine.high %v1036_v15, %v1052_v10 }
 0x323   :  { %v1968_v20 = vsel %vm1293_vm2, %v3792_v28, 0.0 }
 0x324   :  { %v1061_v29 = vrot.slane %v1053_v16, %v3620_v46  ;;  %v1068_v30 = vrot.slane %v1054_v17, %v3620_v46  ;;  %v1077_v31 = vrot.slane %v1069_v18, %v3620_v46  ;;  %v1084_v32 = vrot.slane %v1070_v19, %v3620_v46  ;;  %1951 = vadd.xlane.f32.xlu1 %v1950_v23 }
 0x325   :  { %v3798_v33 = vpop.eup %3249 }
 0x326   :  { %v1157_v34 = vcombine.low %v1061_v29, %v1068_v30  ;;  %v3009_v35 = vcombine.high %v1061_v29, %v1068_v30  ;;  %v1173_v41 = vcombine.low %v1077_v31, %v1084_v32  ;;  %v3010_v42 = vcombine.high %v1077_v31, %v1084_v32  ;;  %v3804_v44 = vpop.eup %3251 }
 0x327   :  { %v1953_v43 = vsel %vm1293_vm2, %v3798_v33, 0.0  ;;  %v3810_v50 = vpop.eup %3253  ;;  %v1956_v25 = vsel %vm1293_vm2, %v3804_v44, 0.0 }
 0x328   :  { %v1164_v45 = vrot.slane %v1157_v34, %v3616_v39  ;;  %v1172_v47 = vrot.slane %v3009_v35, %v3616_v39  ;;  %v1180_v48 = vrot.slane %v1173_v41, %v3616_v39  ;;  %v1188_v49 = vrot.slane %v3010_v42, %v3616_v39  ;;  %1969 = vadd.xlane.f32.xlu1 %v1968_v20  ;;  %v3819_v37 = vpop.eup %3255 }
 0x329   :  { %1954 = vadd.xlane.f32.xlu0 %v1953_v43  ;;  %v1959_v26 = vsel %vm1293_vm2, %v3810_v50, 0.0  ;;  %v1965_v59 = vsel %vm1293_vm2, %v3819_v37, 0.0 }
 0x32a   :  { %v1189_v51 = vcombine.low %v1164_v45, %v1172_v47  ;;  %v1205_v52 = vcombine.low %v1180_v48, %v1188_v49  ;;  %v1190_v53 = vcombine.high %v1164_v45, %v1172_v47  ;;  %v1206_v24 = vcombine.high %v1180_v48, %v1188_v49 }
 0x32c   :  { %1957 = vadd.xlane.f32.xlu1 %v1956_v25  ;;  %v1197_v27 = vrot.slane %v1189_v51, %v3620_v46  ;;  %v1213_v54 = vrot.slane %v1205_v52, %v3620_v46  ;;  %v1204_v36 = vrot.slane %v1190_v53, %v3620_v46  ;;  %v1220_v38 = vrot.slane %v1206_v24, %v3620_v46  ;;  %v3822_v58 = vpop.eup %3257 }
 0x32d   :  { %1960 = vadd.xlane.f32.xlu0 %v1959_v26  ;;  %v1971_v60 = vsel %vm1293_vm2, %v3822_v58, 0.0 }
 0x32e   :  { %v1221_v40 = vcombine.low %v1197_v27, %v1213_v54  ;;  %v1222_v55 = vcombine.high %v1197_v27, %v1213_v54  ;;  %v1223_v56 = vcombine.low %v1204_v36, %v1220_v38  ;;  %v1224_v57 = vcombine.high %v1204_v36, %v1220_v38 }
 0x330   :  { %3174 = vmatpush3.msra.mxu0 %v1221_v40  ;;  %3179 = vmatpush3.msra.mxu1 %v1222_v55 }
 0x331   :  { %1966 = vadd.xlane.f32.xlu0 %v1965_v59  ;;  %3183 = vmatprep.subr.mxu0 %v3457_v22 }
 0x332   :  { %3188 = vmatprep.subr.mxu1 %v3457_v22 }
 0x335   :  { %1972 = vadd.xlane.f32.xlu0 %v1971_v60 }
 0x33d   :  { %1011 = vrot.lane.b32.xlu1 %v3767_v11, %s3456_s6 }
 0x341   :  { %1017 = vrot.lane.b32.xlu1 %v3767_v11, %s3454_s14 }
 0x34b   :  { %1005 = vrot.lane.b32.xlu0 %v3767_v11, %s3455_s15 }
 0x3a9   :  { %v1964_v61 = vpop.xlane.xlu1 %1963 }
 0x3ad   :  { %v1952_v62 = vpop.xlane.xlu1 %1951 }
 0x3ae   :  { %3259 = vrcp.f32 %v1952_v62 }
 0x3b1   :  { %v1970_v63 = vpop.xlane.xlu1 %1969 }
 0x3b2   :  { %v1955_v0 = vpop.xlane.xlu0 %1954 }
 0x3b3   :  { %3261 = vrcp.f32 %v1955_v0 }
 0x3b5   :  { %v1958_v1 = vpop.xlane.xlu1 %1957 }
 0x3b6   :  { %v1961_v2 = vpop.xlane.xlu0 %1960  ;;  %3263 = vrcp.f32 %v1958_v1 }
 0x3b7   :  { %3265 = vrcp.f32 %v1961_v2 }
 0x3b8   :  { %3267 = vrcp.f32 %v1964_v61 }
 0x3b9   :  { %v1012_v5 = vpop.permute.xlu1 %1011 }
 0x3ba   :  { %v1967_v3 = vpop.xlane.xlu0 %1966  ;;  %v1089_v9 = vcombine.low %v3767_v11, %v1012_v5  ;;  %v1090_v10 = vcombine.high %v3767_v11, %v1012_v5 }
 0x3bb   :  { %v3260_v21 = vpop.eup %3259  ;;  %3269 = vrcp.f32 %v1967_v3 }
 0x3bc   :  { %v1975_v6 = vmul.f32 %v3260_v21, %v3786_v13  ;;  %v1097_v19 = vrot.slane %v1089_v9, %v3616_v39  ;;  %v1104_v23 = vrot.slane %v1090_v10, %v3616_v39  ;;  %3271 = vrcp.f32 %v1970_v63 }
 0x3bd   :  { %v1018_v14 = vpop.permute.xlu1 %1017 }
 0x3be   :  { %v1973_v7 = vpop.xlane.xlu0 %1972  ;;  %3176 = vmatmul.mubr.msk.f32.vlgmr.msra.gmra.mxu0 %vm1293_vm2, %v1975_v6 }
 0x3bf   :  { %3184 = vmatpush3.msra.mxu0 %v1223_v56  ;;  %3185 = vmatprep.mubr.msk.f32.mxu0 %vm3458_vm1, %v3457_v22  ;;  %3273 = vrcp.f32 %v1973_v7 }
 0x3c0   :  { %v3262_v8 = vpop.eup %3261  ;;  %3193 = vmatprep.subr.mxu0 %v3457_v22 }
 0x3c1   :  { %v1977_v12 = vmul.f32 %v3262_v8, %v3798_v33 }
 0x3c2   :  { %v1006_v15 = vpop.permute.xlu0 %1005 }
 0x3c3   :  { %v3264_v16 = vpop.eup %3263  ;;  %v1105_v13 = vcombine.low %v1006_v15, %v1018_v14  ;;  %v1106_v17 = vcombine.high %v1006_v15, %v1018_v14  ;;  %3181 = vmatmul.mubr.msk.f32.vlgmr.msra.gmra.mxu1 %vm1293_vm2, %v1977_v12 }
 0x3c4   :  { %v3266_v18 = vpop.eup %3265  ;;  %3189 = vmatpush3.msra.mxu1 %v1224_v57  ;;  %3190 = vmatprep.mubr.msk.f32.mxu1 %vm3458_vm1, %v3457_v22  ;;  %v1979_v11 = vmul.f32 %v3264_v16, %v3804_v44 }
 0x3c5   :  { %v1113_v29 = vrot.slane %v1105_v13, %v3616_v39  ;;  %v1120_v30 = vrot.slane %v1106_v17, %v3616_v39  ;;  %v1981_v31 = vmul.f32 %v3266_v18, %v3810_v50  ;;  %3198 = vmatprep.subr.mxu1 %v3457_v22  ;;  %v3268_v27 = vpop.eup %3267 }
 0x3c6   :  { %3186 = vmatmul.mubr.msk.f32.vlgmr.msra.gmra.mxu0 %vm1293_vm2, %v1979_v11  ;;  %v1983_v60 = vmul.f32 %v3268_v27, %v3780_v4 }
 0x3c7   :  { %v1121_v32 = vcombine.low %v1097_v19, %v1113_v29  ;;  %v1122_v33 = vcombine.high %v1097_v19, %v1113_v29  ;;  %v1137_v34 = vcombine.low %v1104_v23, %v1120_v30  ;;  %v1138_v35 = vcombine.high %v1104_v23, %v1120_v30  ;;  %3191 = vmatmul.mubr.msk.f32.vlgmr.msra.gmra.mxu1 %vm1293_vm2, %v1981_v31 }
 0x3c8   :  { %3195 = vmatprep.mubr.msk.f32.mxu0 %vm3458_vm1, %v3457_v22  ;;  %3200 = vmatprep.mubr.msk.f32.mxu1 %vm3458_vm1, %v3457_v22  ;;  %v3270_v54 = vpop.eup %3269 }
 0x3c9   :  { %v1129_v41 = vrot.slane %v1121_v32, %v3620_v46  ;;  %v1136_v42 = vrot.slane %v1122_v33, %v3620_v46  ;;  %v1145_v20 = vrot.slane %v1137_v34, %v3620_v46  ;;  %v1152_v43 = vrot.slane %v1138_v35, %v3620_v46  ;;  %v3272_v56 = vpop.eup %3271 }
 0x3ca   :  { %v1985_v61 = vmul.f32 %v3270_v54, %v3819_v37  ;;  %v1987_v1 = vmul.f32 %v3272_v56, %v3792_v28 }
 0x3cb   :  { %v1225_v44 = vcombine.low %v1129_v41, %v1136_v42  ;;  %v3011_v45 = vcombine.high %v1129_v41, %v1136_v42  ;;  %v1241_v47 = vcombine.low %v1145_v20, %v1152_v43  ;;  %v3012_v48 = vcombine.high %v1145_v20, %v1152_v43 }
 0x3cc   :  { %v3274_v62 = vpop.eup %3273 }
 0x3cd   :  { %v1232_v49 = vrot.slane %v1225_v44, %v3616_v39  ;;  %v1240_v50 = vrot.slane %v3011_v45, %v3616_v39  ;;  %v1248_v51 = vrot.slane %v1241_v47, %v3616_v39  ;;  %v1256_v52 = vrot.slane %v3012_v48, %v3616_v39 }
 0x3ce   :  { %v1989_v4 = vmul.f32 %v3274_v62, %v3822_v58 }
 0x3cf   :  { %v1257_v53 = vcombine.low %v1232_v49, %v1240_v50  ;;  %v1273_v24 = vcombine.low %v1248_v51, %v1256_v52  ;;  %v1258_v25 = vcombine.high %v1232_v49, %v1240_v50  ;;  %v1274_v26 = vcombine.high %v1248_v51, %v1256_v52 }
 0x3d1   :  { %v1265_v36 = vrot.slane %v1257_v53, %v3620_v46  ;;  %v1281_v38 = vrot.slane %v1273_v24, %v3620_v46  ;;  %v1272_v40 = vrot.slane %v1258_v25, %v3620_v46  ;;  %v1288_v55 = vrot.slane %v1274_v26, %v3620_v46 }
 0x3d3   :  { %v1289_v57 = vcombine.low %v1265_v36, %v1281_v38  ;;  %v1290_v59 = vcombine.high %v1265_v36, %v1281_v38  ;;  %v1291_v63 = vcombine.low %v1272_v40, %v1288_v55  ;;  %v1292_v0 = vcombine.high %v1272_v40, %v1288_v55 }
 0x3d5   :  { %3194 = vmatpush3.msra.mxu0 %v1289_v57  ;;  %3199 = vmatpush3.msra.mxu1 %v1290_v59 }
 0x3d6   :  { %3196 = vmatmul.mubr.msk.f32.vlgmr.msra.gmra.mxu0 %vm1293_vm2, %v1983_v60  ;;  %3201 = vmatmul.mubr.msk.f32.vlgmr.msra.gmra.mxu1 %vm1293_vm2, %v1985_v61 }
 0x3d7   :  { %3203 = vmatprep.subr.mxu0 %v3457_v22  ;;  %3208 = vmatprep.subr.mxu1 %v3457_v22 }
 0x3d8   :  { %3204 = vmatpush3.msra.mxu0 %v1291_v63  ;;  %3209 = vmatpush3.msra.mxu1 %v1292_v0 }
 0x3d9   :  { %3205 = vmatprep.mubr.msk.f32.mxu0 %vm3458_vm1, %v3457_v22  ;;  %3210 = vmatprep.mubr.msk.f32.mxu1 %vm3458_vm1, %v3457_v22 }
 0x3da   :  { %3206 = vmatmul.mubr.msk.f32.vlgmr.msra.gmra.mxu0 %vm1293_vm2, %v1987_v1  ;;  %3211 = vmatmul.mubr.msk.f32.vlgmr.msra.gmra.mxu1 %vm1293_vm2, %v1989_v4 }
 0x47e   :  { %v2059_v37 = vpop.f32.mrf.mxu0 }
 0x480   :  { %v3177_v2 = vpop.f32.mrf.mxu0 }
 0x483   :  { %v2132_v3 = vpop.f32.mrf.mxu1 }
 0x485   :  { %v3182_v21 = vpop.f32.mrf.mxu1 }
 0x486   :  { %v2205_v5 = vpop.f32.mrf.mxu0  ;;  %v2880_v21 = vld [vmem:[#allocation13 + $0x10] sm:$0xff] }
 0x487   :  { %v2574_v6 = vcombine.low %v2059_v37, %v2205_v5  ;;  %v2575_v7 = vcombine.high %v2059_v37, %v2205_v5  ;;  %v2278_v28 = vpop.f32.mrf.mxu1 }
 0x488   :  { %v2590_v8 = vcombine.low %v2132_v3, %v2278_v28  ;;  %v2591_v58 = vcombine.high %v2132_v3, %v2278_v28  ;;  %v3187_v9 = vpop.f32.mrf.mxu0  ;;  %v2881_v3 = vld [vmem:[#allocation13 + $0x18] sm:$0xff] }
 0x489   :  { %v2582_v10 = vrot.slane %v2574_v6, %v3616_v39  ;;  %v2589_v12 = vrot.slane %v2575_v7, %v3616_v39  ;;  %v3192_v22 = vpop.f32.mrf.mxu1  ;;  %3213 = vmatprep.subr.mxu0 %v2881_v3 }
 0x48a   :  { %v2598_v14 = vrot.slane %v2590_v8, %v3616_v39  ;;  %v2605_v15 = vrot.slane %v2591_v58, %v3616_v39  ;;  %3214 = vmatpush3.msra.mxu0 %v2881_v3  ;;  %v2878_v22 = vld [vmem:[#allocation13] sm:$0xff] }
 0x48b   :  { %3215 = vmatprep.subr.mxu0 %v2880_v21 }
 0x48c   :  { %v2606_v16 = vcombine.low %v2582_v10, %v2598_v14  ;;  %v2607_v13 = vcombine.high %v2582_v10, %v2598_v14  ;;  %v2622_v17 = vcombine.low %v2589_v12, %v2605_v15  ;;  %v2623_v18 = vcombine.high %v2589_v12, %v2605_v15  ;;  %3216 = vmatpush3.msra.mxu0 %v2880_v21  ;;  %v2879_v12 = vld [vmem:[#allocation13 + $0x8] sm:$0xff] }
 0x48d   :  { %3217 = vmatprep.subr.mxu0 %v2879_v12 }
 0x48e   :  { %v2614_v19 = vrot.slane %v2606_v16, %v3620_v46  ;;  %v2621_v11 = vrot.slane %v2607_v13, %v3620_v46  ;;  %v2630_v23 = vrot.slane %v2622_v17, %v3620_v46  ;;  %v2637_v29 = vrot.slane %v2623_v18, %v3620_v46  ;;  %3218 = vmatpush3.msra.mxu0 %v2879_v12 }
 0x48f   :  { %3219 = vmatprep.subr.mxu0 %v2878_v22 }
 0x490   :  { %v2710_v30 = vcombine.low %v2614_v19, %v2621_v11  ;;  %v3037_v31 = vcombine.high %v2614_v19, %v2621_v11  ;;  %v2726_v32 = vcombine.low %v2630_v23, %v2637_v29  ;;  %v3038_v33 = vcombine.high %v2630_v23, %v2637_v29  ;;  %3220 = vmatpush3.msra.mxu0 %v2878_v22 }
 0x492   :  { %v2717_v34 = vrot.slane %v2710_v30, %v3616_v39  ;;  %v2725_v35 = vrot.slane %v3037_v31, %v3616_v39  ;;  %v2733_v41 = vrot.slane %v2726_v32, %v3616_v39  ;;  %v2741_v42 = vrot.slane %v3038_v33, %v3616_v39 }
 0x494   :  { %v2742_v20 = vcombine.low %v2717_v34, %v2725_v35  ;;  %v2758_v43 = vcombine.low %v2733_v41, %v2741_v42  ;;  %v2743_v44 = vcombine.high %v2717_v34, %v2725_v35  ;;  %v2759_v45 = vcombine.high %v2733_v41, %v2741_v42 }
 0x496   :  { %v2351_v47 = vpop.f32.mrf.mxu0  ;;  %v2424_v48 = vpop.f32.mrf.mxu1  ;;  %v3899_v49 = vrot.slane %v2742_v20, %v3620_v46  ;;  %v3902_v50 = vrot.slane %v2758_v43, %v3620_v46  ;;  %v2757_v25 = vrot.slane %v2743_v44, %v3620_v46  ;;  %v2773_v26 = vrot.slane %v2759_v45, %v3620_v46 }
 0x498   :  { %v3197_v51 = vpop.f32.mrf.mxu0  ;;  %v3202_v52 = vpop.f32.mrf.mxu1  ;;  %v2775_v53 = vcombine.high %v3899_v49, %v3902_v50  ;;  %v2774_v24 = vcombine.low %v3899_v49, %v3902_v50  ;;  %v2776_v59 = vcombine.low %v2757_v25, %v2773_v26  ;;  %v2777_v2 = vcombine.high %v2757_v25, %v2773_v26  ;;  %v3041_v49 = vld [vmem:[%s3960_s10] ss:$0 sm:$0xff] }
 0x49a   :  { %v2570_v27 = vpop.f32.mrf.mxu1  ;;  %2848 = vrot.lane.b32.xlu0 %v2775_v53, %s3448_s23  ;;  %v2497_v54 = vpop.f32.mrf.mxu0 }
 0x49b   :  { %v2658_v36 = vcombine.low %v2424_v48, %v2570_v27  ;;  %v2659_v38 = vcombine.high %v2424_v48, %v2570_v27  ;;  %v2642_v40 = vcombine.low %v2351_v47, %v2497_v54  ;;  %v2643_v55 = vcombine.high %v2351_v47, %v2497_v54 }
 0x49c   :  { %v3207_v56 = vpop.f32.mrf.mxu0  ;;  %v3212_v57 = vpop.f32.mrf.mxu1 }
 0x49d   :  { %v2666_v60 = vrot.slane %v2658_v36, %v3616_v39  ;;  %v2673_v61 = vrot.slane %v2659_v38, %v3616_v39  ;;  %v2650_v62 = vrot.slane %v2642_v40, %v3616_v39  ;;  %v2657_v63 = vrot.slane %v2643_v55, %v3616_v39 }
 0x49e   :  { %2856 = vrot.lane.b32.xlu0 %v2776_v59, %s3461_s8 }
 0x49f   :  { %v2674_v0 = vcombine.low %v2650_v62, %v2666_v60  ;;  %v2675_v1 = vcombine.high %v2650_v62, %v2666_v60  ;;  %v2690_v4 = vcombine.low %v2657_v63, %v2673_v61  ;;  %v2691_v37 = vcombine.high %v2657_v63, %v2673_v61 }
 0x4a1   :  { %v2682_v5 = vrot.slane %v2674_v0, %v3620_v46  ;;  %v2689_v6 = vrot.slane %v2675_v1, %v3620_v46  ;;  %v2698_v7 = vrot.slane %v2690_v4, %v3620_v46  ;;  %v2705_v28 = vrot.slane %v2691_v37, %v3620_v46 }
 0x4a2   :  { %2864 = vrot.lane.b32.xlu0 %v2777_v2, %s3462_s16 }
 0x4a3   :  { %v2778_v8 = vcombine.low %v2682_v5, %v2689_v6  ;;  %v3039_v58 = vcombine.high %v2682_v5, %v2689_v6  ;;  %v2794_v9 = vcombine.low %v2698_v7, %v2705_v28  ;;  %v3040_v10 = vcombine.high %v2698_v7, %v2705_v28 }
 0x4a5   :  { %v2785_v14 = vrot.slane %v2778_v8, %v3616_v39  ;;  %v2793_v15 = vrot.slane %v3039_v58, %v3616_v39  ;;  %v2801_v16 = vrot.slane %v2794_v9, %v3616_v39  ;;  %v2809_v13 = vrot.slane %v3040_v10, %v3616_v39 }
 0x4a7   :  { %v2810_v17 = vcombine.low %v2785_v14, %v2793_v15  ;;  %v2826_v18 = vcombine.low %v2801_v16, %v2809_v13  ;;  %v2811_v19 = vcombine.high %v2785_v14, %v2793_v15  ;;  %v2827_v11 = vcombine.high %v2801_v16, %v2809_v13 }
 0x4a9   :  { %v2818_v23 = vrot.slane %v2810_v17, %v3620_v46  ;;  %v2834_v29 = vrot.slane %v2826_v18, %v3620_v46  ;;  %v2825_v32 = vrot.slane %v2811_v19, %v3620_v46  ;;  %v2841_v33 = vrot.slane %v2827_v11, %v3620_v46 }
 0x4ab   :  { %v2843_v30 = vcombine.high %v2818_v23, %v2834_v29  ;;  %v2842_v31 = vcombine.low %v2818_v23, %v2834_v29  ;;  %v2844_v39 = vcombine.low %v2825_v32, %v2841_v33  ;;  %v2845_v34 = vcombine.high %v2825_v32, %v2841_v33 }
 0x4ad   :  { %2850 = vrot.lane.b32.xlu1 %v2843_v30, %s3448_s23 }
 0x4b1   :  { %2858 = vrot.lane.b32.xlu1 %v2844_v39, %s3461_s8 }
 0x4b5   :  { %2866 = vrot.lane.b32.xlu1 %v2845_v34, %s3462_s16 }
 0x50c   :  { %v2849_v35 = vpop.permute.xlu0 %2848 }
 0x50d   :  { %v2870_v42 = vsel %vm1293_vm2, %v2774_v24, %v2849_v35 }
 0x510   :  { %v2857_v41 = vpop.permute.xlu0 %2856 }
 0x511   :  { %v2873_v20 = vsel %vm2872_vm3, %v2870_v42, %v2857_v41 }
 0x514   :  { %v2865_v43 = vpop.permute.xlu0 %2864 }
 0x515   :  { %v2876_v46 = vsel %vm2875_vm4, %v2873_v20, %v2865_v43 }
 0x516   :  { %3221 = vmatprep.mubr.msk.f32.mxu0 %vm147_vm0, %v2876_v46 }
 0x51f   :  { %v2851_v44 = vpop.permute.xlu1 %2850 }
 0x520   :  { %v2871_v47 = vsel %vm1293_vm2, %v2842_v31, %v2851_v44 }
 0x523   :  { %v2859_v45 = vpop.permute.xlu1 %2858 }
 0x524   :  { %v2874_v48 = vsel %vm2872_vm3, %v2871_v47, %v2859_v45 }
 0x527   :  { %v2867_v51 = vpop.permute.xlu1 %2866 }
 0x528   :  { %v2877_v52 = vsel %vm2875_vm4, %v2874_v48, %v2867_v51 }
 0x529   :  { %3222 = vmatmul.mubr.msk.f32.vlgmr.msra.gmra.mxu0 %vm147_vm0, %v2877_v52 }
 0x5e9   :  { %v3223_v50 = vpop.f32.mrf.mxu0 }
 0x5ea   :  { %v2967_v53 = vadd.f32 %v3223_v50, %v3041_v49 }
 0x5eb   :  { %v2961_v24 = vpop.f32.mrf.mxu0 }
 0x5ec   :  { %2971 = vst.msk [vmem:[#allocation14 + $0x8] sm:$0xff] %vm147_vm0, %v2967_v53  ;;  %v2962_v25 = vadd.f32 %v3041_v49, %v2961_v24 }
 0x5ee   :  { %2970 = vst.msk [vmem:[#allocation14] sm:$0xff] %vm147_vm0, %v2962_v25 }
 0x5ef   :  { %3426 = shalt.err (!%p3423_p11)
}
 0x5f0   :  { %2983 = dma.vmem_to_hbm [thread:$0]  %s2978_s20, 256, %s3961_s11, [#allocation4], %s3447_s22, %s3447_s22, %s3448_s23  }
 0x5f1   :  { %3443 = dma.done.wait [#allocation4], 256  }
 0x5f2   :  { %3444 = vsyncadd [#allocation4], 4294967040 }
 0x5f3   :  { %2987 = vsyncpa [#allocation3], 1 }
 0x5f4   :  { %2988 = vsyncpa [#allocation6], 1 }
 0x5f5   :  { %2989 = vsyncpa [#allocation9], 1 }
 0x5f6   :  { %2990 = vsyncpa [#allocation12], 1 }
 0x5f7   :  { %2991 = vsyncpa [#allocation4], 1 }

</bundles_post_ra>
